<compile_context>
chip_gen: v7x
topology: tpu7x:2x2x1
jax: 0.10.0
libtpu: 0.0.40
codegen_flags: <defaults>
</compile_context>

<pallas_src>
import math

import jax
import jax.numpy as jnp
from jax.experimental import pallas as pl
from jax.experimental.pallas import tpu as pltpu


def _linear_kernel(x_ref, w_ref, b_ref, o_ref):
    # x_ref: (tm, K), w_ref: (K, H), b_ref: (1, H) f32, o_ref: (tm, H)
    acc = jnp.dot(x_ref[...], w_ref[...], preferred_element_type=jnp.float32)
    o_ref[...] = (acc + b_ref[...]).astype(o_ref.dtype)


def _round_up(x, m):
    return (x + m - 1) // m * m


def _is_v7x():
    try:
        return "v7" in jax.devices()[0].device_kind.lower()
    except Exception:
        return False


def _pick_tile(M, K, H, bpe_x, bpe_out, tm_req, vmem_budget=24 << 20):
    """Row tile: as large as requested, multiple of 256 (or 8-aligned problem size),
    fits the VMEM budget, and keeps >=2 grid steps on v7x only."""
    tm = min(_round_up(tm_req, 256), max(256, _round_up(M, 256)))
    tm = max(8, min(tm, _round_up(M, 8)))

    # v7x has 2 TensorCores: keep at least 2 grid steps so both get work.
    if _is_v7x() and pl.cdiv(M, tm) < 2 and M > 512:
        tm = max(256, _round_up(pl.cdiv(M, 2), 256))
        tm = max(8, min(tm, _round_up(M, 8)))

    def vmem_bytes(t):
        # double-buffered streamed x/out tiles + resident (double-buffered) weight+bias
        return 2 * t * (K * bpe_x + H * bpe_out) + 2 * (K * H * bpe_x + H * 4)

    while tm > 256 and vmem_bytes(tm) > vmem_budget:
        tm = max(256, _round_up(tm // 2, 256))
    return tm, vmem_bytes(tm)


def point_embedding_13c(x, weight, bias, *, tm=None, out_dtype=None):
    """y = x @ weight + bias   (forward of PointEmbedding_13C.fc_C)."""
    orig_shape = x.shape
    K = orig_shape[-1]
    H = weight.shape[1]
    if out_dtype is None:
        out_dtype = x.dtype
    if tm is None:
        tm = 16384 if _is_v7x() else 8192

    x2 = x.reshape(-1, K)
    M = x2.shape[0]

    bpe_x = jnp.dtype(x2.dtype).itemsize
    bpe_w = jnp.dtype(weight.dtype).itemsize
    bpe_out = jnp.dtype(out_dtype).itemsize

    tm_eff, vmem_est = _pick_tile(M, K, H, bpe_x, bpe_out, tm)
    grid_m = pl.cdiv(M, tm_eff)

    # Bias as a (1, H) f32 row (block last dim == full array dim, so no 128-pad needed).
    b2 = bias.astype(jnp.float32).reshape(1, H)

    cost = pl.CostEstimate(
        flops=2 * M * K * H,
        transcendentals=0,
        bytes_accessed=M * K * bpe_x + K * H * bpe_w + H * 4 + M * H * bpe_out,
    )
    vmem_limit = int(min(64 << 20, max(vmem_est + (4 << 20), 8 << 20)))

    out = pl.pallas_call(
        _linear_kernel,
        out_shape=jax.ShapeDtypeStruct((M, H), out_dtype),
        grid_spec=pltpu.PrefetchScalarGridSpec(
            num_scalar_prefetch=0,
            grid=(grid_m,),
            in_specs=[
                # Streamed x row-tile (partial last block handled by Pallas).
                pl.BlockSpec((tm_eff, K), lambda i: (i, 0)),
                # Weight / bias: constant block index -> stay resident in VMEM.
                pl.BlockSpec((K, H), lambda i: (0, 0)),
                pl.BlockSpec((1, H), lambda i: (0, 0)),
            ],
            out_specs=pl.BlockSpec((tm_eff, H), lambda i: (i, 0)),
        ),
        compiler_params=pltpu.CompilerParams(
            dimension_semantics=("parallel",),
            vmem_limit_bytes=vmem_limit,
        ),
        cost_estimate=cost,
    )(x2, weight, b2)

    return out.reshape(*orig_shape[:-1], H)


if __name__ == "__main__":
    IN_DIM, OUT_DIM = 32, 64

    key = jax.random.PRNGKey(0)
    kw, kb, kx1, kx2, kx3 = jax.random.split(key, 5)

    # Deterministic params matching nn.Linear's U(-1/sqrt(K), 1/sqrt(K)) init.
    bound = 1.0 / math.sqrt(IN_DIM)
    weight = jax.random.uniform(kw, (IN_DIM, OUT_DIM), jnp.float32, -bound, bound)
    bias = jax.random.uniform(kb, (OUT_DIM,), jnp.float32, -bound, bound)

    # Case 1: tiny shapes from the module spec (batch=2, seq=8, hidden=32).
    x_small = jax.random.normal(kx1, (2, 8, IN_DIM), jnp.float32)
    y_small = jax.block_until_ready(point_embedding_13c(x_small, weight, bias))
    ref_small = x_small @ weight + bias
    assert y_small.shape == (2, 8, OUT_DIM)
    assert jnp.allclose(y_small, ref_small, atol=2e-2, rtol=2e-2), "small case mismatch"

    # Case 2: moderate M so the large-tile path (single big block / pipelined) is exercised.
    x_big = jax.random.normal(kx2, (2, 1024, IN_DIM), jnp.float32)
    y_big = jax.block_until_ready(point_embedding_13c(x_big, weight, bias))
    ref_big = x_big @ weight + bias
    assert y_big.shape == (2, 1024, OUT_DIM)
    assert jnp.allclose(y_big, ref_big, atol=2e-2, rtol=2e-2), "big case mismatch"

    # Case 3: M not a multiple of the tile -> exercises the partial-last-block
    # (masked write, OOB tail reads never reach HBM) path with a forced small tile.
    x_ragged = jax.random.normal(kx3, (2, 1000, IN_DIM), jnp.float32)
    y_ragged = jax.block_until_ready(point_embedding_13c(x_ragged, weight, bias, tm=256))
    ref_ragged = x_ragged @ weight + bias
    assert y_ragged.shape == (2, 1000, OUT_DIM)
    assert jnp.allclose(y_ragged, ref_ragged, atol=2e-2, rtol=2e-2), "ragged case mismatch"

    print("KERNEL_OK")
</pallas_src>

<mosaic_0001>
module attributes {stable_mosaic.version = 11 : i64} {
  func.func @_linear_kernel(%arg0: i32, %arg1: memref<16x32xf32, #tpu.memory_space<vmem>>, %arg2: memref<32x64xf32, #tpu.memory_space<vmem>>, %arg3: memref<1x64xf32, #tpu.memory_space<vmem>>, %arg4: memref<16x64xf32, #tpu.memory_space<vmem>>) attributes {dimension_semantics = [#tpu.dimension_semantics<parallel>], iteration_bounds = array<i64: 1>, scalar_prefetch = 0 : i64, scratch_operands = 0 : i64, tpu.core_type = #tpu.core_type<tc>, window_params = [{transform_indices = @transform_0, window_bounds = array<i64: 16, 32>}, {pipeline_mode = #tpu.pipeline_mode<synchronous>, transform_indices = @transform_1, window_bounds = array<i64: 32, 64>}, {pipeline_mode = #tpu.pipeline_mode<synchronous>, transform_indices = @transform_2, window_bounds = array<i64: 1, 64>}, {transform_indices = @transform_3, window_bounds = array<i64: 16, 64>}]} {
    %c0 = arith.constant 0 : index
    %c0_0 = arith.constant 0 : index
    %0 = vector.load %arg1[%c0, %c0_0] : memref<16x32xf32, #tpu.memory_space<vmem>>, vector<16x32xf32>
    %c0_1 = arith.constant 0 : index
    %c0_2 = arith.constant 0 : index
    %1 = vector.load %arg2[%c0_1, %c0_2] : memref<32x64xf32, #tpu.memory_space<vmem>>, vector<32x64xf32>
    %cst = arith.constant dense<0.000000e+00> : vector<16x64xf32>
    %2 = tpu.matmul %0, %1, %cst {dimension_numbers = #tpu.dot_dimension_numbers<[1], [0], [0], [1], [0, 0, 1, 1], [], []>} : vector<16x32xf32>, vector<32x64xf32>, vector<16x64xf32> -> vector<16x64xf32>
    %c0_3 = arith.constant 0 : index
    %c0_4 = arith.constant 0 : index
    %3 = vector.load %arg3[%c0_3, %c0_4] : memref<1x64xf32, #tpu.memory_space<vmem>>, vector<1x64xf32>
    %4 = vector.broadcast %3 : vector<1x64xf32> to vector<16x64xf32>
    %5 = arith.addf %2, %4 : vector<16x64xf32>
    %c0_5 = arith.constant 0 : index
    %c0_6 = arith.constant 0 : index
    %6 = vector.load %arg4[%c0_5, %c0_6] : memref<16x64xf32, #tpu.memory_space<vmem>>, vector<16x64xf32>
    tpu.vector_store %arg4[%c0_5, %c0_6], %5 {strides = array<i32>} : memref<16x64xf32, #tpu.memory_space<vmem>>, vector<16x64xf32>,
    return
  }
  func.func @transform_0(%arg0: i32) -> (i32, i32) {
    %c0_i32 = arith.constant 0 : i32
    %c0_i32_0 = arith.constant 0 : i32
    return %arg0, %c0_i32 : i32, i32
  }
  func.func @transform_1(%arg0: i32) -> (i32, i32) {
    %c0_i32 = arith.constant 0 : i32
    %c0_i32_0 = arith.constant 0 : i32
    %c0_i32_1 = arith.constant 0 : i32
    return %c0_i32, %c0_i32_0 : i32, i32
  }
  func.func @transform_2(%arg0: i32) -> (i32, i32) {
    %c0_i32 = arith.constant 0 : i32
    %c0_i32_0 = arith.constant 0 : i32
    %c0_i32_1 = arith.constant 0 : i32
    return %c0_i32, %c0_i32_0 : i32, i32
  }
  func.func @transform_3(%arg0: i32) -> (i32, i32) {
    %c0_i32 = arith.constant 0 : i32
    %c0_i32_0 = arith.constant 0 : i32
    return %arg0, %c0_i32 : i32, i32
  }
}

</mosaic_0001>

<bundles_post_ra>
// kernel: tpu_custom_call.1
= control target key start
LH: loop header
LB: loop body
LE: loop exit
PB: predicated region body
PF: predicated region fallthrough
CT: control target
= control target key end

     0   :  { %8 = vsyncpa [#allocation3], 0  ;;  %s337_s0 = inlined_call_operand.hbm [shape: f32[16,32], index: 0, kind: input, shape index: {}]   ;;  %s338_s1 = inlined_call_operand.hbm [shape: f32[32,64], index: 1, kind: input, shape index: {}]   ;;  %s339_s2 = inlined_call_operand.vmem [shape: f32[1,64], index: 2, kind: input, shape index: {}]   ;;  %s340_s3 = inlined_call_operand.hbm [shape: f32[16,64], index: 3, kind: output, shape index: {}]  }
   0x1   :  { %9 = vsyncpa [#allocation6], 0 }
   0x2   :  { %10 = vsyncpa [#allocation4], 0  ;;  %s264_s12 = smov [#allocation2]   ;;  %s192_s16 = scalar_lea.hbm %s337_s0, 256 }
   0x3   :  { %s16_s13 = sshll.u32 %s264_s12, 4  ;;  %p193_p0 = scmp.ne.s32.totalorder %s337_s0, %s192_s16  ;;  %s17_s13 = int_to_ptr.vmem [resolvable:$true] %s16_s13 }
   0x4   :  { %p196_p1 = scmp.lt.u32.totalorder %s192_s16, %s337_s0 }
   0x6   :  { %p198_p2 = pnand %p196_p1, %p193_p0 }
   0x8   :  { %201 = shalt.err (!%p198_p2)
}
   0x9   :  { %s202_s21 = scalar_lea.vmem %s17_s13, 256  ;;  %p207_p4 = scmp.lt.s32.totalorder %s17_s13, %s17_s13 }
   0xa   :  { %p203_p3 = scmp.ne.s32.totalorder %s17_s13, %s202_s21  ;;  %p208_p5 = scmp.lt.s32.totalorder %s202_s21, %s202_s21 }
   0xc   :  { %p209_p6 = por %p208_p5, %p207_p4 }
   0xe   :  { %p210_p7 = pnand %p209_p6, %p203_p3 }
  0x10   :  { %213 = shalt.err (!%p210_p7)
}
  0x11   :  { %s265_s22 = smov 128   ;;  %s266_s23 = smov 8  }
  0x12   :  { %22 = dma.hbm_to_vmem [thread:$0]  %s337_s0, 256, %s17_s13, [#allocation3], %s265_s22, %s265_s22, %s266_s23  }
  0x13   :  { %s267_s26 = smov [#allocation5]   ;;  %s214_s30 = scalar_lea.hbm %s338_s1, 512 }
  0x14   :  { %s28_s27 = sshll.u32 %s267_s26, 4  ;;  %p215_p8 = scmp.ne.s32.totalorder %s338_s1, %s214_s30  ;;  %s29_s27 = int_to_ptr.vmem [resolvable:$true] %s28_s27 }
  0x15   :  { %p218_p9 = scmp.lt.u32.totalorder %s214_s30, %s338_s1 }
  0x17   :  { %p220_p10 = pnand %p218_p9, %p215_p8 }
  0x19   :  { %223 = shalt.err (!%p220_p10)
}
  0x1a   :  { %s224_s8 = scalar_lea.vmem %s29_s27, 512  ;;  %p229_p12 = scmp.lt.s32.totalorder %s29_s27, %s29_s27 }
  0x1b   :  { %p225_p11 = scmp.ne.s32.totalorder %s29_s27, %s224_s8  ;;  %p230_p13 = scmp.lt.s32.totalorder %s224_s8, %s224_s8 }
  0x1d   :  { %p231_p0 = por %p230_p13, %p229_p12 }
  0x1f   :  { %p232_p1 = pnand %p231_p0, %p225_p11 }
  0x21   :  { %235 = shalt.err (!%p232_p1)
}
  0x22   :  { %34 = dma.hbm_to_vmem [thread:$0]  %s338_s1, 512, %s29_s27, [#allocation6], %s265_s22, %s265_s22, %s266_s23  }
  0x23   :  { %258 = dma.done.wait [#allocation3], 256  }
  0x24   :  { %259 = vsyncadd [#allocation3], 4294967040 }
  0x25   :  { %260 = dma.done.wait [#allocation6], 512  }
  0x26   :  { %261 = vsyncadd [#allocation6], 4294966784  ;;  %vm56_vm0 = vcmask 261120   ;;  %v45_v0 = vld [vmem:[#allocation5] sm:$0xff]  ;;  %v46_v1 = vld [vmem:[#allocation5 + $0x8] sm:$0xff]  ;;  %s268_s11 = smov [#allocation7]  }
  0x27   :  { %v47_v2 = vld [vmem:[#allocation5 + $0x10] sm:$0xff]  ;;  %v179_v3 = vpack.c.bf16 %v46_v1, %v45_v0  ;;  %v48_v4 = vld [vmem:[#allocation5 + $0x18] sm:$0xff]  ;;  %s146_s12 = sshll.u32 %s268_s11, 4  ;;  %vm138_vm1 = vcmask 523264   ;;  %s147_s12 = int_to_ptr.vmem [resolvable:$true] %s146_s12 }
  0x28   :  { %v43_v5 = vld [vmem:[#allocation2] sm:$0xff]  ;;  %v183_v6 = vpack.c.bf16 %v48_v4, %v47_v2  ;;  %v44_v7 = vld [vmem:[#allocation2 + $0x8] sm:$0xff]  ;;  %s236_s13 = scalar_lea.vmem %s147_s12, 256  ;;  %p241_p3 = scmp.lt.s32.totalorder %s147_s12, %s147_s12 }
  0x29   :  { %176 = vmatprep.mubr.msk.f32.mxu0 %vm56_vm0, %v43_v5  ;;  %180 = vmatprep.subr.bf16.mxu0 %v179_v3  ;;  %v159_v8 = vld [vmem:[%s339_s2] ss:$0 sm:$0xff]  ;;  %p237_p2 = scmp.ne.s32.totalorder %s147_s12, %s236_s13  ;;  %p242_p4 = scmp.lt.s32.totalorder %s236_s13, %s236_s13 }
  0x2a   :  { %182 = vmatpush3.bf16.msra.mxu0 %v179_v3 }
  0x2b   :  { %184 = vmatprep.subr.bf16.mxu0 %v183_v6  ;;  %p243_p5 = por %p242_p4, %p241_p3 }
  0x2d   :  { %p244_p6 = pnand %p243_p5, %p237_p2 }
  0x2e   :  { %186 = vmatpush3.bf16.msra.mxu0 %v183_v6 }
  0x31   :  { %177 = vmatmul.mubr.msk.f32.vlgmr.msra.gmra.mrb[0].mxu0 %vm56_vm0, %v44_v7 }
 0x104   :  { %v178_v9 = vpop.f32.mrb[0].mxu0 }
 0x105   :  { %v135_v10 = vadd.f32 %v178_v9, %v159_v8  ;;  %v129_v11 = vpop.f32.mrb[1].mxu0 }
 0x106   :  { %v130_v12 = vadd.f32 %v159_v8, %v129_v11 }
 0x107   :  { %140 = vst.msk [vmem:[#allocation7 + $0x8] sm:$0xff] %vm138_vm1, %v135_v10 }
 0x108   :  { %139 = vst.msk [vmem:[#allocation7] sm:$0xff] %vm138_vm1, %v130_v12 }
 0x109   :  { %247 = shalt.err (!%p244_p6)
}
 0x10a   :  { %s248_s2 = scalar_lea.hbm %s340_s3, 256 }
 0x10b   :  { %p249_p7 = scmp.ne.s32.totalorder %s340_s3, %s248_s2  ;;  %p252_p8 = scmp.lt.u32.totalorder %s248_s2, %s340_s3 }
 0x10d   :  { %p254_p9 = pnand %p252_p8, %p249_p7 }
 0x10f   :  { %257 = shalt.err (!%p254_p9)
}
 0x110   :  { %152 = dma.vmem_to_hbm [thread:$0]  %s147_s12, 256, %s340_s3, [#allocation4], %s265_s22, %s265_s22, %s266_s23  }
 0x111   :  { %262 = dma.done.wait [#allocation4], 256  }
 0x112   :  { %263 = vsyncadd [#allocation4], 4294967040 }
 0x113   :  { %156 = vsyncpa [#allocation3], 1 }
 0x114   :  { %157 = vsyncpa [#allocation6], 1 }
 0x115   :  { %158 = vsyncpa [#allocation4], 1 }

</bundles_post_ra>
